<compile_context>
chip_gen: v7x
topology: tpu7x:2x2x1
jax: 0.10.0
libtpu: 0.0.40
codegen_flags: <defaults>
</compile_context>

<pallas_src>
import functools

import jax
import jax.numpy as jnp
from jax.experimental import pallas as pl
from jax.experimental.pallas import tpu as pltpu

EPS = 1e-5


# ---------------------------------------------------------------------------
# Kernel 1: per-channel batch statistics (sum and sum of squares)
# ---------------------------------------------------------------------------
def _make_stats_kernel(tm, m_total):
    need_mask = (m_total % tm) != 0  # only mask ragged tails (static decision)

    def kernel(x_ref, sum_ref, sq_ref):
        i = pl.program_id(0)

        @pl.when(i == 0)
        def _():
            sum_ref[...] = jnp.zeros_like(sum_ref)
            sq_ref[...] = jnp.zeros_like(sq_ref)

        x = x_ref[...].astype(jnp.float32)                     # (tm, C)
        if need_mask:
            rows = jax.lax.broadcasted_iota(jnp.int32, x.shape, 0) + i * tm
            x = jnp.where(rows < m_total, x, 0.0)
        sum_ref[...] += jnp.sum(x, axis=0, keepdims=True)      # (1, C)
        sq_ref[...] += jnp.sum(x * x, axis=0, keepdims=True)   # (1, C)

    return kernel


def batch_stats(x_flat, tm_target=1024):
    """x_flat: (M, C) -> (mean, biased var), each (C,) float32."""
    M, C = x_flat.shape
    tm = min(tm_target, M)                 # big streaming tiles (roofline)
    grid = (pl.cdiv(M, tm),)               # ragged tail masked in-kernel
    kernel = _make_stats_kernel(tm, M)
    sums, sqs = pl.pallas_call(
        kernel,
        out_shape=(jax.ShapeDtypeStruct((1, C), jnp.float32),
                   jax.ShapeDtypeStruct((1, C), jnp.float32)),
        grid=grid,
        in_specs=[pl.BlockSpec((tm, C), lambda i: (i, 0))],
        out_specs=(pl.BlockSpec((1, C), lambda i: (0, 0)),
                   pl.BlockSpec((1, C), lambda i: (0, 0))),
        compiler_params=pltpu.CompilerParams(
            dimension_semantics=("arbitrary",)),   # accumulator across grid
    )(x_flat)
    mean = sums[0] / M
    # NOTE: E[x^2] - E[x]^2 in f32 — fine for roughly-centered activations.
    var = jnp.maximum(sqs[0] / M - mean * mean, 0.0)
    return mean, var


# ---------------------------------------------------------------------------
# Kernel 2: fused (folded-BN) 1x1 conv + 2x2 avg pool
#   x_ref: (tr, 2, Wo, 2C)  -- dim1 = H parity, last dim = (W parity, C)
#   w_ref: (2C, Cout)        -- 0.25*scale-folded conv weight, duplicated on K
#   b_ref: (1, Cout)         -- shift @ W  (BN shift folded through the conv)
#   o_ref: (tr*Wo, Cout)
# ---------------------------------------------------------------------------
def _fused_kernel(x_ref, w_ref, b_ref, o_ref):
    xs = x_ref[:, 0, :, :] + x_ref[:, 1, :, :]          # H-pair sum: (tr, Wo, 2C)
    tr, wo, k2 = xs.shape
    xs2 = xs.reshape(tr * wo, k2)                        # layout-preserving when Wo%8==0
    # W-pair pooling + channel mixing happen inside this single MXU matmul.
    y = jnp.dot(xs2, w_ref[...], preferred_element_type=jnp.float32)
    o_ref[...] = (y + b_ref[...]).astype(o_ref.dtype)


def _pick_row_tile(R, Wo, K2, itemsize, max_rows=256,
                   block_budget_bytes=8 * 1024 * 1024):
    """Largest divisor of R (row-pairs) that fits a per-block VMEM budget."""
    per_row = 2 * Wo * K2 * itemsize
    cap = max(1, min(max_rows, block_budget_bytes // max(per_row, 1)))
    for d in range(min(R, cap), 0, -1):
        if R % d == 0:
            return d
    return 1


def bn_conv_pool(xv, w2, bias, Wo, Cout):
    """xv: (N*Ho, 2, Wo, 2C) view of NHWC activations -> (N*Ho*Wo, Cout)."""
    R, _, _, K2 = xv.shape
    tr = _pick_row_tile(R, Wo, K2, xv.dtype.itemsize)
    grid = (R // tr,)
    return pl.pallas_call(
        _fused_kernel,
        out_shape=jax.ShapeDtypeStruct((R * Wo, Cout), xv.dtype),
        grid=grid,
        in_specs=[pl.BlockSpec((tr, 2, Wo, K2), lambda i: (i, 0, 0, 0)),
                  pl.BlockSpec((K2, Cout), lambda i: (0, 0)),
                  pl.BlockSpec((1, Cout), lambda i: (0, 0))],
        out_specs=pl.BlockSpec((tr * Wo, Cout), lambda i: (i, 0)),
        compiler_params=pltpu.CompilerParams(
            dimension_semantics=("parallel",),        # shards across TCs (v7x)
            vmem_limit_bytes=64 * 1024 * 1024),
    )(xv, w2, bias)


# ---------------------------------------------------------------------------
# Module forward (wrapper: layout plumbing + BN/pool weight folding)
# ---------------------------------------------------------------------------
def transition_rense_forward(x_nchw, gamma, beta, w_oc_ic11):
    N, C, H, W = x_nchw.shape
    Cout = w_oc_ic11.shape[0]
    Ho, Wo = H // 2, W // 2

    # Single layout change: channels to the lane dim. All later reshapes are
    # row-major-compatible (free views).
    x_nhwc = jnp.transpose(x_nchw, (0, 2, 3, 1))              # (N, H, W, C)

    # BatchNorm (training-mode) batch statistics on the FULL input.
    mean, var = batch_stats(x_nhwc.reshape(N * H * W, C))
    scale = gamma.astype(jnp.float32) / jnp.sqrt(var + EPS)   # (C,)
    shift = beta.astype(jnp.float32) - mean * scale           # (C,)

    # Fold BN affine + 0.25 pool factor into the conv weight; fold the BN
    # shift through the conv into a per-output-channel bias.
    wf = w_oc_ic11.reshape(Cout, C).astype(jnp.float32)       # (Cout, C)
    w_eff = 0.25 * (scale[:, None] * wf.T)                    # (C, Cout)
    bias = (wf @ shift).reshape(1, Cout)                      # (1, Cout) f32
    # Duplicate along K so the even/odd-W channel pair (interleaved into the
    # lane dim by the free reshape below) is summed by the matmul itself.
    w2 = jnp.concatenate([w_eff, w_eff], axis=0)              # (2C, Cout)
    w2 = w2.astype(x_nchw.dtype)   # bf16 inputs -> bf16 MXU; f32 stays exact

    # Crop odd spatial tails (AvgPool2d floors), then the free view:
    # (N*Ho, 2, Wo, 2C) — dim1 = H parity, last dim packs (W parity, C).
    xv = x_nhwc[:, :2 * Ho, :2 * Wo, :].reshape(N * Ho, 2, Wo, 2 * C)

    y = bn_conv_pool(xv, w2, bias, Wo, Cout)                  # (N*Ho*Wo, Cout)
    y = y.reshape(N, Ho, Wo, Cout)
    return jnp.transpose(y, (0, 3, 1, 2))                     # NCHW


# ---------------------------------------------------------------------------
# Pure-JAX reference for verification
# ---------------------------------------------------------------------------
def reference(x, gamma, beta, w_oc_ic11):
    mean = x.mean(axis=(0, 2, 3))
    var = x.var(axis=(0, 2, 3))  # biased
    xn = (x - mean[None, :, None, None]) / jnp.sqrt(var[None, :, None, None] + EPS)
    xn = xn * gamma[None, :, None, None] + beta[None, :, None, None]
    wf = w_oc_ic11.reshape(w_oc_ic11.shape[0], w_oc_ic11.shape[1])
    y = jnp.einsum('nchw,oc->nohw', xn, wf)
    N, Co, Hh, Ww = y.shape
    return y.reshape(N, Co, Hh // 2, 2, Ww // 2, 2).mean(axis=(3, 5))


if __name__ == "__main__":
    key = jax.random.PRNGKey(0)
    k1, k2 = jax.random.split(key, 2)

    N, C, H, W = 2, 4, 16, 16
    Cout = 8

    x = jax.random.normal(k1, (N, C, H, W), jnp.float32)

    # Deterministic parameter init (matches module __init__ shapes):
    gamma = jnp.ones((C,), jnp.float32)        # BatchNorm2d weight
    beta = jnp.zeros((C,), jnp.float32)        # BatchNorm2d bias
    bound = 1.0 / (C ** 0.5)                   # Conv2d default init bound
    w = jax.random.uniform(k2, (Cout, C, 1, 1), jnp.float32, -bound, bound)

    fwd = jax.jit(transition_rense_forward)
    out = fwd(x, gamma, beta, w)
    out = jax.block_until_ready(out)

    ref = reference(x, gamma, beta, w)
    assert out.shape == (N, Cout, H // 2, W // 2), out.shape
    err = float(jnp.max(jnp.abs(out - ref)))
    assert jnp.allclose(out, ref, atol=2e-4, rtol=2e-4), err
    print("KERNEL_OK")
</pallas_src>

<mosaic_0001>
module attributes {stable_mosaic.version = 11 : i64} {
  func.func @kernel(%arg0: i32, %arg1: memref<512x4xf32, #tpu.memory_space<vmem>>, %arg2: memref<1x4xf32, #tpu.memory_space<vmem>>, %arg3: memref<1x4xf32, #tpu.memory_space<vmem>>) attributes {dimension_semantics = [#tpu.dimension_semantics<arbitrary>], iteration_bounds = array<i64: 1>, scalar_prefetch = 0 : i64, scratch_operands = 0 : i64, tpu.core_type = #tpu.core_type<tc>, window_params = [{transform_indices = @transform_0, window_bounds = array<i64: 512, 4>}, {pipeline_mode = #tpu.pipeline_mode<synchronous>, transform_indices = @transform_1, window_bounds = array<i64: 1, 4>}, {pipeline_mode = #tpu.pipeline_mode<synchronous>, transform_indices = @transform_2, window_bounds = array<i64: 1, 4>}]} {
    %c0_i32 = arith.constant 0 : i32
    %0 = arith.cmpi eq, %arg0, %c0_i32 : i32
    %1 = arith.extui %0 : i1 to i32
    %c0_i32_0 = arith.constant 0 : i32
    %2 = arith.cmpi ne, %1, %c0_i32_0 : i32
    scf.if %2 {
      %cst_11 = arith.constant 0.000000e+00 : f32
      %15 = vector.broadcast %cst_11 : f32 to vector<1x4xf32>
      %c0_12 = arith.constant 0 : index
      %c0_13 = arith.constant 0 : index
      %16 = vector.load %arg2[%c0_12, %c0_13] : memref<1x4xf32, #tpu.memory_space<vmem>>, vector<1x4xf32>
      tpu.vector_store %arg2[%c0_12, %c0_13], %15 {strides = array<i32>} : memref<1x4xf32, #tpu.memory_space<vmem>>, vector<1x4xf32>,
      %cst_14 = arith.constant 0.000000e+00 : f32
      %17 = vector.broadcast %cst_14 : f32 to vector<1x4xf32>
      %c0_15 = arith.constant 0 : index
      %c0_16 = arith.constant 0 : index
      %18 = vector.load %arg3[%c0_15, %c0_16] : memref<1x4xf32, #tpu.memory_space<vmem>>, vector<1x4xf32>
      tpu.vector_store %arg3[%c0_15, %c0_16], %17 {strides = array<i32>} : memref<1x4xf32, #tpu.memory_space<vmem>>, vector<1x4xf32>,
    } else {
    }
    %c0 = arith.constant 0 : index
    %c0_1 = arith.constant 0 : index
    %3 = vector.load %arg1[%c0, %c0_1] : memref<512x4xf32, #tpu.memory_space<vmem>>, vector<512x4xf32>
    %c0_2 = arith.constant 0 : index
    %c0_3 = arith.constant 0 : index
    %4 = vector.load %arg2[%c0_2, %c0_3] : memref<1x4xf32, #tpu.memory_space<vmem>>, vector<1x4xf32>
    %cst = arith.constant dense<0.000000e+00> : vector<4xf32>
    %5 = vector.multi_reduction <add>, %3, %cst [0] : vector<512x4xf32> to vector<4xf32>
    %6 = vector.shape_cast %5 : vector<4xf32> to vector<1x4xf32>
    %7 = arith.addf %4, %6 : vector<1x4xf32>
    %c0_4 = arith.constant 0 : index
    %c0_5 = arith.constant 0 : index
    %8 = vector.load %arg2[%c0_4, %c0_5] : memref<1x4xf32, #tpu.memory_space<vmem>>, vector<1x4xf32>
    tpu.vector_store %arg2[%c0_4, %c0_5], %7 {strides = array<i32>} : memref<1x4xf32, #tpu.memory_space<vmem>>, vector<1x4xf32>,
    %c0_6 = arith.constant 0 : index
    %c0_7 = arith.constant 0 : index
    %9 = vector.load %arg3[%c0_6, %c0_7] : memref<1x4xf32, #tpu.memory_space<vmem>>, vector<1x4xf32>
    %10 = arith.mulf %3, %3 : vector<512x4xf32>
    %cst_8 = arith.constant dense<0.000000e+00> : vector<4xf32>
    %11 = vector.multi_reduction <add>, %10, %cst_8 [0] : vector<512x4xf32> to vector<4xf32>
    %12 = vector.shape_cast %11 : vector<4xf32> to vector<1x4xf32>
    %13 = arith.addf %9, %12 : vector<1x4xf32>
    %c0_9 = arith.constant 0 : index
    %c0_10 = arith.constant 0 : index
    %14 = vector.load %arg3[%c0_9, %c0_10] : memref<1x4xf32, #tpu.memory_space<vmem>>, vector<1x4xf32>
    tpu.vector_store %arg3[%c0_9, %c0_10], %13 {strides = array<i32>} : memref<1x4xf32, #tpu.memory_space<vmem>>, vector<1x4xf32>,
    return
  }
  func.func @transform_0(%arg0: i32) -> (i32, i32) {
    %c0_i32 = arith.constant 0 : i32
    %c0_i32_0 = arith.constant 0 : i32
    return %arg0, %c0_i32 : i32, i32
  }
  func.func @transform_1(%arg0: i32) -> (i32, i32) {
    %c0_i32 = arith.constant 0 : i32
    %c0_i32_0 = arith.constant 0 : i32
    %c0_i32_1 = arith.constant 0 : i32
    return %c0_i32, %c0_i32_0 : i32, i32
  }
  func.func @transform_2(%arg0: i32) -> (i32, i32) {
    %c0_i32 = arith.constant 0 : i32
    %c0_i32_0 = arith.constant 0 : i32
    %c0_i32_1 = arith.constant 0 : i32
    return %c0_i32, %c0_i32_0 : i32, i32
  }
}

module attributes {stable_mosaic.version = 11 : i64} {
  func.func @_fused_kernel(%arg0: i32, %arg1: memref<16x2x8x8xf32, #tpu.memory_space<vmem>>, %arg2: memref<8x8xf32, #tpu.memory_space<vmem>>, %arg3: memref<1x8xf32, #tpu.memory_space<vmem>>, %arg4: memref<128x8xf32, #tpu.memory_space<vmem>>) attributes {dimension_semantics = [#tpu.dimension_semantics<parallel>], iteration_bounds = array<i64: 1>, scalar_prefetch = 0 : i64, scratch_operands = 0 : i64, tpu.core_type = #tpu.core_type<tc>, window_params = [{transform_indices = @transform_0, window_bounds = array<i64: 16, 2, 8, 8>}, {pipeline_mode = #tpu.pipeline_mode<synchronous>, transform_indices = @transform_1, window_bounds = array<i64: 8, 8>}, {pipeline_mode = #tpu.pipeline_mode<synchronous>, transform_indices = @transform_2, window_bounds = array<i64: 1, 8>}, {transform_indices = @transform_3, window_bounds = array<i64: 128, 8>}]} {
    %c0 = arith.constant 0 : index
    %c0_0 = arith.constant 0 : index
    %c0_1 = arith.constant 0 : index
    %c0_2 = arith.constant 0 : index
    %0 = vector.load %arg1[%c0, %c0_0, %c0_1, %c0_2] : memref<16x2x8x8xf32, #tpu.memory_space<vmem>>, vector<16x1x8x8xf32>
    %1 = vector.shape_cast %0 : vector<16x1x8x8xf32> to vector<16x8x8xf32>
    %c0_3 = arith.constant 0 : index
    %c1 = arith.constant 1 : index
    %c0_4 = arith.constant 0 : index
    %c0_5 = arith.constant 0 : index
    %2 = vector.load %arg1[%c0_3, %c1, %c0_4, %c0_5] : memref<16x2x8x8xf32, #tpu.memory_space<vmem>>, vector<16x1x8x8xf32>
    %3 = vector.shape_cast %2 : vector<16x1x8x8xf32> to vector<16x8x8xf32>
    %4 = arith.addf %1, %3 : vector<16x8x8xf32>
    %5 = vector.shape_cast %4 : vector<16x8x8xf32> to vector<128x8xf32>
    %c0_6 = arith.constant 0 : index
    %c0_7 = arith.constant 0 : index
    %6 = vector.load %arg2[%c0_6, %c0_7] : memref<8x8xf32, #tpu.memory_space<vmem>>, vector<8x8xf32>
    %cst = arith.constant dense<0.000000e+00> : vector<128x8xf32>
    %7 = tpu.matmul %5, %6, %cst {dimension_numbers = #tpu.dot_dimension_numbers<[1], [0], [0], [1], [0, 0, 1, 1], [], []>} : vector<128x8xf32>, vector<8x8xf32>, vector<128x8xf32> -> vector<128x8xf32>
    %c0_8 = arith.constant 0 : index
    %c0_9 = arith.constant 0 : index
    %8 = vector.load %arg3[%c0_8, %c0_9] : memref<1x8xf32, #tpu.memory_space<vmem>>, vector<1x8xf32>
    %9 = vector.broadcast %8 : vector<1x8xf32> to vector<128x8xf32>
    %10 = arith.addf %7, %9 : vector<128x8xf32>
    %c0_10 = arith.constant 0 : index
    %c0_11 = arith.constant 0 : index
    %11 = vector.load %arg4[%c0_10, %c0_11] : memref<128x8xf32, #tpu.memory_space<vmem>>, vector<128x8xf32>
    tpu.vector_store %arg4[%c0_10, %c0_11], %10 {strides = array<i32>} : memref<128x8xf32, #tpu.memory_space<vmem>>, vector<128x8xf32>,
    return
  }
  func.func @transform_0(%arg0: i32) -> (i32, i32, i32, i32) {
    %c0_i32 = arith.constant 0 : i32
    %c0_i32_0 = arith.constant 0 : i32
    %c0_i32_1 = arith.constant 0 : i32
    %c0_i32_2 = arith.constant 0 : i32
    return %arg0, %c0_i32, %c0_i32_0, %c0_i32_1 : i32, i32, i32, i32
  }
  func.func @transform_1(%arg0: i32) -> (i32, i32) {
    %c0_i32 = arith.constant 0 : i32
    %c0_i32_0 = arith.constant 0 : i32
    %c0_i32_1 = arith.constant 0 : i32
    return %c0_i32, %c0_i32_0 : i32, i32
  }
  func.func @transform_2(%arg0: i32) -> (i32, i32) {
    %c0_i32 = arith.constant 0 : i32
    %c0_i32_0 = arith.constant 0 : i32
    %c0_i32_1 = arith.constant 0 : i32
    return %c0_i32, %c0_i32_0 : i32, i32
  }
  func.func @transform_3(%arg0: i32) -> (i32, i32) {
    %c0_i32 = arith.constant 0 : i32
    %c0_i32_0 = arith.constant 0 : i32
    return %arg0, %c0_i32 : i32, i32
  }
}

</mosaic_0001>

<bundles_post_ra>
// kernel: transition_rense_forward.2
= control target key start
LH: loop header
LB: loop body
LE: loop exit
PB: predicated region body
PF: predicated region fallthrough
CT: control target
= control target key end

     0   :  { %vm14_vm0 = vcmask 24576   ;;  %vm82_vm1 = vcmask 31744   ;;  %v428_v0 = vmov 0.0   ;;  %s1318_s0 = inlined_call_operand.vmem [shape: f32[512,4], index: 0, kind: input, shape index: {}]   ;;  %s1319_s1 = inlined_call_operand.vmem [shape: f32[1,4], index: 1, kind: output, shape index: {0}]   ;;  %s1320_s2 = inlined_call_operand.vmem [shape: f32[1,4], index: 2, kind: output, shape index: {1}]  }
   0x1   :  { %15 = vst.msk [vmem:[%s1319_s1] sm:$0x1] %vm14_vm0, %v428_v0  ;;  %16 = vst.msk [vmem:[%s1320_s2] sm:$0x1] %vm14_vm0, %v428_v0  ;;  %v455_v1 = vld [vmem:[%s1318_s0] sm:$0xff]  ;;  %v460_v2 = vld [vmem:[%s1318_s0 + $0x8] sm:$0xff] }
   0x2   :  { %v465_v3 = vld [vmem:[%s1318_s0 + $0x10] sm:$0xff]  ;;  %v83_v4 = vsel %vm82_vm1, %v455_v1, 0.0  ;;  %v84_v5 = vsel %vm82_vm1, %v460_v2, 0.0  ;;  %v476_v7 = vld [vmem:[%s1318_s0 + $0x18] sm:$0xff]  ;;  %v483_v10 = vld [vmem:[%s1318_s0 + $0x20] sm:$0xff] }
   0x3   :  { %v86_v6 = vsel %vm82_vm1, %v465_v3, 0.0  ;;  %v85_v8 = vadd.f32 %v84_v5, %v83_v4  ;;  %v88_v9 = vsel %vm82_vm1, %v476_v7, 0.0  ;;  %v90_v12 = vsel %vm82_vm1, %v483_v10, 0.0  ;;  %v490_v13 = vld [vmem:[%s1318_s0 + $0x28] sm:$0xff]  ;;  %v497_v16 = vld [vmem:[%s1318_s0 + $0x30] sm:$0xff]  ;;  %v502_v18 = vld [vmem:[%s1318_s0 + $0x38] sm:$0xff] }
   0x4   :  { %v92_v15 = vsel %vm82_vm1, %v490_v13, 0.0  ;;  %v507_v19 = vld [vmem:[%s1318_s0 + $0x40] sm:$0xff]  ;;  %v94_v20 = vsel %vm82_vm1, %v497_v16, 0.0  ;;  %v514_v21 = vld [vmem:[%s1318_s0 + $0x48] sm:$0xff]  ;;  %v519_v22 = vld [vmem:[%s1318_s0 + $0x50] sm:$0xff]  ;;  %v96_v25 = vsel %vm82_vm1, %v502_v18, 0.0 }
   0x5   :  { %v87_v11 = vadd.f32 %v86_v6, %v85_v8  ;;  %v524_v23 = vld [vmem:[%s1318_s0 + $0x58] sm:$0xff]  ;;  %v98_v26 = vsel %vm82_vm1, %v507_v19, 0.0  ;;  %v533_v27 = vld [vmem:[%s1318_s0 + $0x108] sm:$0xff]  ;;  %v538_v28 = vld [vmem:[%s1318_s0 + $0x110] sm:$0xff]  ;;  %v100_v30 = vsel %vm82_vm1, %v514_v21, 0.0  ;;  %v102_v31 = vsel %vm82_vm1, %v519_v22, 0.0 }
   0x6   :  { %v543_v29 = vld [vmem:[%s1318_s0 + $0x118] sm:$0xff]  ;;  %v551_v32 = vsel %vm82_vm1, %v524_v23, 0.0  ;;  %v556_v33 = vld [vmem:[%s1318_s0 + $0x120] sm:$0xff]  ;;  %v561_v34 = vld [vmem:[%s1318_s0 + $0x128] sm:$0xff]  ;;  %v570_v37 = vsel %vm82_vm1, %v533_v27, 0.0  ;;  %v574_v38 = vsel %vm82_vm1, %v538_v28, 0.0 }
   0x7   :  { %v89_v14 = vadd.f32 %v88_v9, %v87_v11  ;;  %v566_v35 = vld [vmem:[%s1318_s0 + $0x130] sm:$0xff]  ;;  %1339 = vst [vmem:[#allocation2_spill] sm:$0xff] %v570_v37  ;;  %1340 = vst [vmem:[#allocation3_spill] sm:$0xff] %v574_v38  ;;  %v578_v39 = vsel %vm82_vm1, %v543_v29, 0.0  ;;  %v583_v40 = vld [vmem:[%s1318_s0 + $0x138] sm:$0xff]  ;;  %v597_v43 = vsel %vm82_vm1, %v556_v33, 0.0  ;;  %v222_v37 = vmul.f32 %v465_v3, %v465_v3 }
   0x8   :  { %1341 = vst [vmem:[#allocation4_spill] sm:$0xff] %v578_v39  ;;  %v588_v41 = vld [vmem:[%s1318_s0 + $0x140] sm:$0xff]  ;;  %v593_v42 = vld [vmem:[%s1318_s0 + $0x148] sm:$0xff]  ;;  %1342 = vst [vmem:[#allocation5_spill] sm:$0xff] %v597_v43  ;;  %v601_v44 = vsel %vm82_vm1, %v561_v34, 0.0  ;;  %v605_v45 = vsel %vm82_vm1, %v566_v35, 0.0 }
   0x9   :  { %v91_v17 = vadd.f32 %v90_v12, %v89_v14  ;;  %1343 = vst [vmem:[#allocation6_spill] sm:$0xff] %v601_v44  ;;  %1344 = vst [vmem:[#allocation7_spill] sm:$0xff] %v605_v45  ;;  %v610_v46 = vld [vmem:[%s1318_s0 + $0x150] sm:$0xff]  ;;  %v615_v47 = vld [vmem:[%s1318_s0 + $0x158] sm:$0xff]  ;;  %v624_v50 = vsel %vm82_vm1, %v583_v40, 0.0  ;;  %v628_v51 = vsel %vm82_vm1, %v588_v41, 0.0 }
   0xa   :  { %v620_v48 = vld [vmem:[%s1318_s0 + $0x160] sm:$0xff]  ;;  %1345 = vst [vmem:[#allocation8_spill] sm:$0xff] %v624_v50  ;;  %1346 = vst [vmem:[#allocation9_spill] sm:$0xff] %v628_v51  ;;  %v632_v52 = vsel %vm82_vm1, %v593_v42, 0.0  ;;  %v637_v53 = vld [vmem:[%s1318_s0 + $0x168] sm:$0xff]  ;;  %v651_v56 = vsel %vm82_vm1, %v610_v46, 0.0 }
   0xb   :  { %v93_v24 = vadd.f32 %v92_v15, %v91_v17  ;;  %1347 = vst [vmem:[#allocation10_spill] sm:$0xff] %v632_v52  ;;  %v642_v54 = vld [vmem:[%s1318_s0 + $0x170] sm:$0xff]  ;;  %v647_v55 = vld [vmem:[%s1318_s0 + $0x178] sm:$0xff]  ;;  %1348 = vst [vmem:[#allocation11_spill] sm:$0xff] %v651_v56  ;;  %v655_v57 = vsel %vm82_vm1, %v615_v47, 0.0  ;;  %v659_v58 = vsel %vm82_vm1, %v620_v48, 0.0 }
   0xc   :  { %1349 = vst [vmem:[#allocation12_spill] sm:$0xff] %v655_v57  ;;  %1350 = vst [vmem:[#allocation13_spill] sm:$0xff] %v659_v58  ;;  %v664_v59 = vld [vmem:[%s1318_s0 + $0x180] sm:$0xff]  ;;  %v669_v60 = vld [vmem:[%s1318_s0 + $0x188] sm:$0xff]  ;;  %v678_v63 = vsel %vm82_vm1, %v637_v53, 0.0  ;;  %v682_v0 = vsel %vm82_vm1, %v642_v54, 0.0 }
   0xd   :  { %v95_v36 = vadd.f32 %v94_v20, %v93_v24  ;;  %v674_v61 = vld [vmem:[%s1318_s0 + $0x190] sm:$0xff]  ;;  %1351 = vst [vmem:[#allocation14_spill] sm:$0xff] %v678_v63  ;;  %1352 = vst [vmem:[#allocation15_spill] sm:$0xff] %v682_v0  ;;  %v686_v4 = vsel %vm82_vm1, %v647_v55, 0.0  ;;  %v691_v5 = vld [vmem:[%s1318_s0 + $0x198] sm:$0xff]  ;;  %v705_v9 = vsel %vm82_vm1, %v664_v59, 0.0 }
   0xe   :  { %1353 = vst [vmem:[#allocation16_spill] sm:$0xff] %v686_v4  ;;  %v696_v6 = vld [vmem:[%s1318_s0 + $0x1a0] sm:$0xff]  ;;  %v701_v8 = vld [vmem:[%s1318_s0 + $0x1a8] sm:$0xff]  ;;  %1354 = vst [vmem:[#allocation17_spill] sm:$0xff] %v705_v9  ;;  %v709_v11 = vsel %vm82_vm1, %v669_v60, 0.0  ;;  %v713_v12 = vsel %vm82_vm1, %v674_v61, 0.0 }
   0xf   :  { %v97_v49 = vadd.f32 %v96_v25, %v95_v36  ;;  %1355 = vst [vmem:[#allocation18_spill] sm:$0xff] %v709_v11  ;;  %1356 = vst [vmem:[#allocation19_spill] sm:$0xff] %v713_v12  ;;  %v718_v14 = vld [vmem:[%s1318_s0 + $0x60] sm:$0xff]  ;;  %v723_v15 = vld [vmem:[%s1318_s0 + $0x1b0] sm:$0xff]  ;;  %v737_v25 = vsel %vm82_vm1, %v691_v5, 0.0  ;;  %v745_v36 = vsel %vm82_vm1, %v701_v8, 0.0 }
  0x10   :  { %v728_v17 = vld [vmem:[%s1318_s0 + $0x1b8] sm:$0xff]  ;;  %v733_v20 = vld [vmem:[%s1318_s0 + $0x1c0] sm:$0xff]  ;;  %1357 = vst [vmem:[#allocation20_spill] sm:$0xff] %v737_v25  ;;  %1359 = vst [vmem:[#allocation22_spill] sm:$0xff] %v745_v36 }
  0x11   :  { %v99_v62 = vadd.f32 %v98_v26, %v97_v49  ;;  %v741_v26 = vsel %vm82_vm1, %v696_v6, 0.0  ;;  %v750_v49 = vld [vmem:[%s1318_s0 + $0x1c8] sm:$0xff]  ;;  %v768_v36 = vsel %vm82_vm1, %v728_v17, 0.0  ;;  %v772_v25 = vsel %vm82_vm1, %v733_v20, 0.0  ;;  %v777_v12 = vld [vmem:[%s1318_s0 + $0x1e0] sm:$0xff]  ;;  %v804_v0 = vld [vmem:[%s1318_s0 + $0x1f8] sm:$0xff] }
  0x12   :  { %1358 = vst [vmem:[#allocation21_spill] sm:$0xff] %v741_v26  ;;  %v764_v26 = vsel %vm82_vm1, %v723_v15, 0.0  ;;  %1361 = vst [vmem:[#allocation24_spill] sm:$0xff] %v768_v36  ;;  %v782_v11 = vld [vmem:[%s1318_s0 + $0x1e8] sm:$0xff]  ;;  %v791_v9 = vsel %vm82_vm1, %v750_v49, 0.0  ;;  %v826_v58 = vsel %vm82_vm1, %v804_v0, 0.0 }
  0x13   :  { %v101_v24 = vadd.f32 %v100_v30, %v99_v62  ;;  %v755_v30 = vld [vmem:[%s1318_s0 + $0x1d0] sm:$0xff]  ;;  %v760_v62 = vld [vmem:[%s1318_s0 + $0x1d8] sm:$0xff]  ;;  %1360 = vst [vmem:[#allocation23_spill] sm:$0xff] %v764_v26  ;;  %1362 = vst [vmem:[#allocation25_spill] sm:$0xff] %v772_v25 }
  0x14   :  { %v787_v26 = vld [vmem:[%s1318_s0 + $0x1f0] sm:$0xff]  ;;  %1364 = vst [vmem:[#allocation27_spill] sm:$0xff] %v791_v9  ;;  %v795_v25 = vsel %vm82_vm1, %v755_v30, 0.0  ;;  %v799_v4 = vsel %vm82_vm1, %v760_v62, 0.0  ;;  %1367 = vst [vmem:[#allocation30_spill] sm:$0xff] %v804_v0  ;;  %v814_v9 = vsel %vm82_vm1, %v782_v11, 0.0 }
  0x15   :  { %1363 = vst [vmem:[#allocation26_spill] sm:$0xff] %v787_v26  ;;  %v103_v36 = vadd.f32 %v102_v31, %v101_v24  ;;  %1365 = vst [vmem:[#allocation28_spill] sm:$0xff] %v795_v25  ;;  %v106_v31 = vsel %vm82_vm1, %v718_v14, 0.0  ;;  %v810_v24 = vsel %vm82_vm1, %v777_v12, 0.0  ;;  %v818_v25 = vsel %vm82_vm1, %v787_v26, 0.0  ;;  %v855_v56 = vld [vmem:[%s1318_s0 + $0x90] sm:$0xff] }
  0x16   :  { %1366 = vst [vmem:[#allocation29_spill] sm:$0xff] %v799_v4  ;;  %1368 = vst [vmem:[#allocation31_spill] sm:$0xff] %v810_v24  ;;  %v30_v4 = vld [vmem:[%s1318_s0 + $0x68] sm:$0xff]  ;;  %v860_v52 = vld [vmem:[%s1318_s0 + $0x98] sm:$0xff] }
  0x17   :  { %1369 = vst [vmem:[#allocation32_spill] sm:$0xff] %v814_v9  ;;  %1370 = vst [vmem:[#allocation33_spill] sm:$0xff] %v818_v25  ;;  %v105_v63 = vadd.f32 %v551_v32, %v103_v36  ;;  %v108_v24 = vsel %vm82_vm1, %v30_v4, 0.0  ;;  %v31_v9 = vld [vmem:[%s1318_s0 + $0x70] sm:$0xff]  ;;  %v835_v25 = vld [vmem:[%s1318_s0 + $0x78] sm:$0xff]  ;;  %v120_v39 = vsel %vm82_vm1, %v860_v52, 0.0 }
  0x18   :  { %1371 = vst [vmem:[#allocation34_spill] sm:$0xff] %v826_v58  ;;  %1372 = vst [vmem:[#allocation35_spill] sm:$0xff] %v835_v25  ;;  %v840_v32 = vld [vmem:[%s1318_s0 + $0x80] sm:$0xff]  ;;  %v845_v36 = vld [vmem:[%s1318_s0 + $0x88] sm:$0xff]  ;;  %v110_v58 = vsel %vm82_vm1, %v31_v9, 0.0 }
  0x19   :  { %v107_v57 = vadd.f32 %v106_v31, %v105_v63  ;;  %1373 = vst [vmem:[#allocation36_spill] sm:$0xff] %v840_v32  ;;  %1374 = vst [vmem:[#allocation37_spill] sm:$0xff] %v845_v36  ;;  %v220_v63 = vmul.f32 %v455_v1, %v455_v1  ;;  %v221_v31 = vmul.f32 %v460_v2, %v460_v2  ;;  %v865_v51 = vld [vmem:[%s1318_s0 + $0xa0] sm:$0xff]  ;;  %v112_v1 = vsel %vm82_vm1, %v835_v25, 0.0  ;;  %v876_v44 = vld [vmem:[%s1318_s0 + $0xa8] sm:$0xff] }
  0x1a   :  { %1375 = vst [vmem:[#allocation38_spill] sm:$0xff] %v855_v56  ;;  %1376 = vst [vmem:[#allocation39_spill] sm:$0xff] %v860_v52  ;;  %v114_v2 = vsel %vm82_vm1, %v840_v32, 0.0  ;;  %v116_v45 = vsel %vm82_vm1, %v845_v36, 0.0  ;;  %v881_v43 = vld [vmem:[%s1318_s0 + $0xb0] sm:$0xff]  ;;  %v122_v38 = vsel %vm82_vm1, %v865_v51, 0.0  ;;  %v223_v25 = vmul.f32 %v476_v7, %v476_v7 }
  0x1b   :  { %1377 = vst [vmem:[#allocation40_spill] sm:$0xff] %v865_v51  ;;  %v109_v50 = vadd.f32 %v108_v24, %v107_v57  ;;  %1378 = vst [vmem:[#allocation41_spill] sm:$0xff] %v876_v44  ;;  %v886_v57 = vld [vmem:[%s1318_s0 + $0xb8] sm:$0xff]  ;;  %v118_v24 = vsel %vm82_vm1, %v855_v56, 0.0  ;;  %v899_v36 = vld [vmem:[%s1318_s0 + $0xc0] sm:$0xff]  ;;  %v124_v51 = vsel %vm82_vm1, %v876_v44, 0.0 }
  0x1c   :  { %1379 = vst [vmem:[#allocation42_spill] sm:$0xff] %v881_v43  ;;  %1380 = vst [vmem:[#allocation43_spill] sm:$0xff] %v886_v57  ;;  %v904_v32 = vld [vmem:[%s1318_s0 + $0xc8] sm:$0xff]  ;;  %v909_v52 = vld [vmem:[%s1318_s0 + $0xd0] sm:$0xff]  ;;  %v915_v3 = vsel %vm82_vm1, %v881_v43, 0.0 }
  0x1d   :  { %1381 = vst [vmem:[#allocation44_spill] sm:$0xff] %v899_v36  ;;  %1382 = vst [vmem:[#allocation45_spill] sm:$0xff] %v904_v32  ;;  %v111_v56 = vadd.f32 %v110_v58, %v109_v50  ;;  %v922_v0 = vld [vmem:[%s1318_s0 + $0xd8] sm:$0xff]  ;;  %v927_v26 = vld [vmem:[%s1318_s0 + $0xe0] sm:$0xff]  ;;  %v931_v50 = vsel %vm82_vm1, %v886_v57, 0.0  ;;  %v935_v58 = vsel %vm82_vm1, %v899_v36, 0.0 }
  0x1e   :  { %1383 = vst [vmem:[#allocation46_spill] sm:$0xff] %v909_v52  ;;  %1384 = vst [vmem:[#allocation47_spill] sm:$0xff] %v922_v0  ;;  %v939_v7 = vsel %vm82_vm1, %v904_v32, 0.0  ;;  %v943_v43 = vsel %vm82_vm1, %v909_v52, 0.0  ;;  %v948_v44 = vld [vmem:[%s1318_s0 + $0xe8] sm:$0xff]  ;;  %v953_v57 = vld [vmem:[%s1318_s0 + $0xf0] sm:$0xff]  ;;  %v224_v52 = vmul.f32 %v483_v10, %v483_v10  ;;  %v228_v10 = vmul.f32 %v507_v19, %v507_v19 }
  0x1f   :  { %1385 = vst [vmem:[#allocation48_spill] sm:$0xff] %v927_v26  ;;  %1386 = vst [vmem:[#allocation49_spill] sm:$0xff] %v935_v58  ;;  %v113_v36 = vadd.f32 %v112_v1, %v111_v56  ;;  %v957_v58 = vsel %vm82_vm1, %v922_v0, 0.0  ;;  %v961_v32 = vsel %vm82_vm1, %v927_v26, 0.0  ;;  %v225_v56 = vmul.f32 %v490_v13, %v490_v13 }
  0x20   :  { %1387 = vst [vmem:[#allocation50_spill] sm:$0xff] %v939_v7  ;;  %1388 = vst [vmem:[#allocation51_spill] sm:$0xff] %v943_v43  ;;  %v967_v43 = vsel %vm82_vm1, %v948_v44, 0.0  ;;  %v971_v7 = vsel %vm82_vm1, %v953_v57, 0.0  ;;  %v226_v1 = vmul.f32 %v497_v16, %v497_v16  ;;  %v227_v26 = vmul.f32 %v502_v18, %v502_v18 }
  0x21   :  { %1389 = vst [vmem:[#allocation52_spill] sm:$0xff] %v948_v44  ;;  %1390 = vst [vmem:[#allocation53_spill] sm:$0xff] %v953_v57  ;;  %v115_v0 = vadd.f32 %v114_v2, %v113_v36  ;;  %v229_v44 = vmul.f32 %v514_v21, %v514_v21  ;;  %v230_v57 = vmul.f32 %v519_v22, %v519_v22 }
  0x22   :  { %1391 = vst [vmem:[#allocation54_spill] sm:$0xff] %v971_v7  ;;  %v231_v7 = vmul.f32 %v524_v23, %v524_v23  ;;  %v232_v13 = vmul.f32 %v718_v14, %v718_v14  ;;  %v989_v16 = vmul.f32 %v30_v4, %v30_v4  ;;  %v991_v2 = vmul.f32 %v31_v9, %v31_v9 }
  0x23   :  { %v117_v36 = vadd.f32 %v116_v45, %v115_v0  ;;  %v253_v18 = vmul.f32 %v533_v27, %v533_v27  ;;  %v254_v19 = vmul.f32 %v538_v28, %v538_v28  ;;  %v255_v21 = vmul.f32 %v543_v29, %v543_v29 }
  0x24   :  { %v256_v22 = vmul.f32 %v556_v33, %v556_v33  ;;  %v257_v23 = vmul.f32 %v561_v34, %v561_v34  ;;  %v258_v45 = vmul.f32 %v566_v35, %v566_v35  ;;  %v259_v4 = vmul.f32 %v583_v40, %v583_v40 }
  0x25   :  { %v119_v0 = vadd.f32 %v118_v24, %v117_v36  ;;  %v260_v27 = vmul.f32 %v588_v41, %v588_v41  ;;  %v261_v28 = vmul.f32 %v593_v42, %v593_v42  ;;  %v262_v29 = vmul.f32 %v610_v46, %v610_v46 }
  0x26   :  { %v263_v33 = vmul.f32 %v615_v47, %v615_v47  ;;  %v284_v34 = vsel %vm82_vm1, %v220_v63, 0.0  ;;  %v285_v35 = vsel %vm82_vm1, %v221_v31, 0.0  ;;  %v264_v40 = vmul.f32 %v620_v48, %v620_v48 }
  0x27   :  { %v121_v9 = vadd.f32 %v120_v39, %v119_v0  ;;  %v286_v14 = vadd.f32 %v285_v35, %v284_v34  ;;  %v287_v41 = vsel %vm82_vm1, %v222_v37, 0.0  ;;  %v265_v42 = vmul.f32 %v637_v53, %v637_v53  ;;  %v1392_v0 = vld [vmem:[#allocation26_spill] sm:$0xff] }
  0x28   :  { %v266_v46 = vmul.f32 %v642_v54, %v642_v54  ;;  %v267_v47 = vmul.f32 %v647_v55, %v647_v55  ;;  %v289_v63 = vsel %vm82_vm1, %v223_v25, 0.0  ;;  %v268_v39 = vmul.f32 %v664_v59, %v664_v59  ;;  %v1393_v34 = vld [vmem:[#allocation30_spill] sm:$0xff] }
  0x29   :  { %v123_v24 = vadd.f32 %v122_v38, %v121_v9  ;;  %v269_v48 = vmul.f32 %v669_v60, %v669_v60  ;;  %v288_v31 = vadd.f32 %v287_v41, %v286_v14  ;;  %v270_v37 = vmul.f32 %v674_v61, %v674_v61  ;;  %v1394_v41 = vld [vmem:[#allocation49_spill] sm:$0xff] }
  0x2a   :  { %v271_v53 = vmul.f32 %v691_v5, %v691_v5  ;;  %v272_v54 = vmul.f32 %v696_v6, %v696_v6  ;;  %v291_v55 = vsel %vm82_vm1, %v224_v52, 0.0  ;;  %v273_v38 = vmul.f32 %v701_v8, %v701_v8 }
  0x2b   :  { %v125_v25 = vadd.f32 %v124_v51, %v123_v24  ;;  %v274_v59 = vmul.f32 %v723_v15, %v723_v15  ;;  %v290_v60 = vadd.f32 %v289_v63, %v288_v31  ;;  %v275_v36 = vmul.f32 %v728_v17, %v728_v17 }
  0x2c   :  { %v276_v61 = vmul.f32 %v733_v20, %v733_v20  ;;  %v277_v5 = vmul.f32 %v750_v49, %v750_v49  ;;  %v293_v6 = vsel %vm82_vm1, %v225_v56, 0.0  ;;  %v278_v52 = vmul.f32 %v755_v30, %v755_v30 }
  0x2d   :  { %v127_v51 = vadd.f32 %v915_v3, %v125_v25  ;;  %v279_v8 = vmul.f32 %v760_v62, %v760_v62  ;;  %v292_v15 = vadd.f32 %v291_v55, %v290_v60  ;;  %v280_v17 = vmul.f32 %v777_v12, %v777_v12  ;;  %v1396_v25 = vld [vmem:[#allocation51_spill] sm:$0xff] }
  0x2e   :  { %v281_v20 = vmul.f32 %v782_v11, %v782_v11  ;;  %v282_v49 = vmul.f32 %v1392_v0, %v1392_v0  ;;  %v295_v56 = vsel %vm82_vm1, %v226_v1, 0.0  ;;  %v283_v30 = vmul.f32 %v1393_v34, %v1393_v34  ;;  %v1398_v34 = vld [vmem:[#allocation54_spill] sm:$0xff] }
  0x2f   :  { %v129_v3 = vadd.f32 %v931_v50, %v127_v51  ;;  %v294_v35 = vadd.f32 %v293_v6, %v292_v15  ;;  %v297_v62 = vsel %vm82_vm1, %v227_v26, 0.0  ;;  %v299_v9 = vsel %vm82_vm1, %v228_v10, 0.0 }
  0x30   :  { %v301_v12 = vsel %vm82_vm1, %v229_v44, 0.0  ;;  %v303_v14 = vsel %vm82_vm1, %v230_v57, 0.0  ;;  %v305_v11 = vsel %vm82_vm1, %v231_v7, 0.0  ;;  %v307_v1 = vsel %vm82_vm1, %v232_v13, 0.0  ;;  %v1395_v7 = vld [vmem:[#allocation50_spill] sm:$0xff] }
  0x31   :  { %v131_v63 = vadd.f32 %v1394_v41, %v129_v3  ;;  %v296_v24 = vadd.f32 %v295_v56, %v294_v35  ;;  %v1072_v50 = vsel %vm82_vm1, %v253_v18, 0.0  ;;  %v1075_v31 = vsel %vm82_vm1, %v254_v19, 0.0  ;;  %v1397_v56 = vld [vmem:[#allocation35_spill] sm:$0xff] }
  0x32   :  { %v1078_v26 = vsel %vm82_vm1, %v255_v21, 0.0  ;;  %v1081_v44 = vsel %vm82_vm1, %v256_v22, 0.0  ;;  %v1084_v57 = vsel %vm82_vm1, %v257_v23, 0.0  ;;  %v1088_v13 = vsel %vm82_vm1, %v258_v45, 0.0 }
  0x33   :  { %v133_v10 = vadd.f32 %v1395_v7, %v131_v63  ;;  %v298_v55 = vadd.f32 %v297_v62, %v296_v24  ;;  %v1091_v18 = vsel %vm82_vm1, %v259_v4, 0.0  ;;  %v1094_v19 = vsel %vm82_vm1, %v260_v27, 0.0  ;;  %v1399_v62 = vld [vmem:[#allocation36_spill] sm:$0xff] }
  0x34   :  { %v1097_v21 = vsel %vm82_vm1, %v261_v28, 0.0  ;;  %v1100_v22 = vsel %vm82_vm1, %v262_v29, 0.0  ;;  %v1103_v23 = vsel %vm82_vm1, %v263_v33, 0.0  ;;  %v1107_v45 = vsel %vm82_vm1, %v264_v40, 0.0 }
  0x35   :  { %v135_v60 = vadd.f32 %v1396_v25, %v133_v10  ;;  %v300_v6 = vadd.f32 %v299_v9, %v298_v55  ;;  %v1110_v4 = vsel %vm82_vm1, %v265_v42, 0.0  ;;  %v1113_v27 = vsel %vm82_vm1, %v266_v46, 0.0  ;;  %v1401_v10 = vld [vmem:[#allocation38_spill] sm:$0xff] }
  0x36   :  { %v1116_v28 = vsel %vm82_vm1, %v267_v47, 0.0  ;;  %v1119_v29 = vsel %vm82_vm1, %v268_v39, 0.0  ;;  %v1122_v33 = vsel %vm82_vm1, %v269_v48, 0.0  ;;  %v1126_v40 = vsel %vm82_vm1, %v270_v37, 0.0  ;;  %v1402_v25 = vld [vmem:[#allocation2_spill] sm:$0xff] }
  0x37   :  { %v137_v51 = vadd.f32 %v957_v58, %v135_v60  ;;  %v302_v15 = vadd.f32 %v301_v12, %v300_v6  ;;  %v1129_v42 = vsel %vm82_vm1, %v271_v53, 0.0  ;;  %v1132_v46 = vsel %vm82_vm1, %v272_v54, 0.0 }
  0x38   :  { %v1135_v47 = vsel %vm82_vm1, %v273_v38, 0.0  ;;  %v1138_v39 = vsel %vm82_vm1, %v274_v59, 0.0  ;;  %v1141_v48 = vsel %vm82_vm1, %v275_v36, 0.0  ;;  %v1145_v37 = vsel %vm82_vm1, %v276_v61, 0.0 }
  0x39   :  { %v139_v58 = vadd.f32 %v961_v32, %v137_v51  ;;  %v304_v0 = vadd.f32 %v303_v14, %v302_v15  ;;  %v1148_v53 = vsel %vm82_vm1, %v277_v5, 0.0  ;;  %v1151_v54 = vsel %vm82_vm1, %v278_v52, 0.0  ;;  %v1165_v32 = vld [vmem:[%s1318_s0 + $0xf8] sm:$0xff]  ;;  %v1403_v51 = vld [vmem:[#allocation39_spill] sm:$0xff] }
  0x3a   :  { %v1154_v38 = vsel %vm82_vm1, %v279_v8, 0.0  ;;  %v1157_v59 = vsel %vm82_vm1, %v280_v17, 0.0  ;;  %v1160_v36 = vsel %vm82_vm1, %v281_v20, 0.0  ;;  %v1169_v52 = vsel %vm82_vm1, %v282_v49, 0.0 }
  0x3b   :  { %v141_v61 = vadd.f32 %v967_v43, %v139_v58  ;;  %v306_v5 = vadd.f32 %v305_v11, %v304_v0  ;;  %v1172_v8 = vsel %vm82_vm1, %v283_v30, 0.0  ;;  %v144_v17 = vsel %vm82_vm1, %v1165_v32, 0.0  ;;  %v1183_v43 = vld [vmem:[%s1318_s0 + $0x100] sm:$0xff]  ;;  %v1404_v58 = vld [vmem:[#allocation3_spill] sm:$0xff] }
  0x3c   :  { %v235_v20 = vmul.f32 %v1397_v56, %v1397_v56  ;;  %v309_v3 = vsel %vm82_vm1, %v989_v16, 0.0  ;;  %v146_v30 = vsel %vm82_vm1, %v1183_v43, 0.0  ;;  %v236_v9 = vmul.f32 %v1399_v62, %v1399_v62  ;;  %v1400_v16 = vld [vmem:[#allocation37_spill] sm:$0xff] }
  0x3d   :  { %v143_v49 = vadd.f32 %v1398_v34, %v141_v61  ;;  %v308_v35 = vadd.f32 %v307_v1, %v306_v5  ;;  %v311_v12 = vsel %vm82_vm1, %v991_v2, 0.0  ;;  %v237_v41 = vmul.f32 %v1400_v16, %v1400_v16  ;;  %v1405_v5 = vld [vmem:[#allocation40_spill] sm:$0xff]  ;;  %v1408_v62 = vld [vmem:[#allocation5_spill] sm:$0xff] }
  0x3e   :  { %v313_v63 = vsel %vm82_vm1, %v235_v20, 0.0  ;;  %v238_v1 = vmul.f32 %v1401_v10, %v1401_v10  ;;  %v315_v55 = vsel %vm82_vm1, %v236_v9, 0.0  ;;  %v239_v2 = vmul.f32 %v1403_v51, %v1403_v51  ;;  %v1406_v20 = vld [vmem:[#allocation4_spill] sm:$0xff] }
  0x3f   :  { %v145_v14 = vadd.f32 %v144_v17, %v143_v49  ;;  %v310_v11 = vadd.f32 %v309_v3, %v308_v35  ;;  %v317_v15 = vsel %vm82_vm1, %v237_v41, 0.0  ;;  %v240_v17 = vmul.f32 %v1405_v5, %v1405_v5  ;;  %v1407_v49 = vld [vmem:[#allocation41_spill] sm:$0xff]  ;;  %v1410_v41 = vld [vmem:[#allocation6_spill] sm:$0xff] }
  0x40   :  { %v319_v56 = vsel %vm82_vm1, %v238_v1, 0.0  ;;  %v241_v35 = vmul.f32 %v1407_v49, %v1407_v49 }
  0x41   :  { %v147_v24 = vadd.f32 %v146_v30, %v145_v14  ;;  %v312_v7 = vadd.f32 %v311_v12, %v310_v11  ;;  %v321_v30 = vsel %vm82_vm1, %v239_v2, 0.0  ;;  %v1409_v14 = vld [vmem:[#allocation42_spill] sm:$0xff]  ;;  %v323_v16 = vsel %vm82_vm1, %v240_v17, 0.0 }
  0x42   :  { %v242_v11 = vmul.f32 %v1409_v14, %v1409_v14  ;;  %v325_v1 = vsel %vm82_vm1, %v241_v35, 0.0 }
  0x43   :  { %v149_v60 = vadd.f32 %v1402_v25, %v147_v24  ;;  %v314_v6 = vadd.f32 %v313_v63, %v312_v7  ;;  %v1411_v7 = vld [vmem:[#allocation43_spill] sm:$0xff] }
  0x44   :  { %v243_v10 = vmul.f32 %v1411_v7, %v1411_v7  ;;  %v327_v2 = vsel %vm82_vm1, %v242_v11, 0.0 }
  0x45   :  { %v151_v0 = vadd.f32 %v1404_v58, %v149_v60  ;;  %v316_v61 = vadd.f32 %v315_v55, %v314_v6  ;;  %v1412_v55 = vld [vmem:[#allocation7_spill] sm:$0xff]  ;;  %v1413_v6 = vld [vmem:[#allocation44_spill] sm:$0xff] }
  0x46   :  { %v244_v51 = vmul.f32 %v1413_v6, %v1413_v6  ;;  %v329_v17 = vsel %vm82_vm1, %v243_v10, 0.0 }
  0x47   :  { %v153_v3 = vadd.f32 %v1406_v20, %v151_v0  ;;  %v318_v34 = vadd.f32 %v317_v15, %v316_v61  ;;  %v1414_v15 = vld [vmem:[#allocation8_spill] sm:$0xff]  ;;  %v1415_v61 = vld [vmem:[#allocation45_spill] sm:$0xff] }
  0x48   :  { %v245_v5 = vmul.f32 %v1415_v61, %v1415_v61  ;;  %v331_v35 = vsel %vm82_vm1, %v244_v51, 0.0 }
  0x49   :  { %v155_v9 = vadd.f32 %v1408_v62, %v153_v3  ;;  %v320_v12 = vadd.f32 %v319_v56, %v318_v34  ;;  %v1416_v56 = vld [vmem:[#allocation9_spill] sm:$0xff]  ;;  %v1417_v34 = vld [vmem:[#allocation46_spill] sm:$0xff] }
  0x4a   :  { %v246_v49 = vmul.f32 %v1417_v34, %v1417_v34  ;;  %v333_v11 = vsel %vm82_vm1, %v245_v5, 0.0 }
  0x4b   :  { %v157_v63 = vadd.f32 %v1410_v41, %v155_v9  ;;  %v322_v24 = vadd.f32 %v321_v30, %v320_v12  ;;  %v1418_v30 = vld [vmem:[#allocation10_spill] sm:$0xff]  ;;  %v1419_v12 = vld [vmem:[#allocation47_spill] sm:$0xff] }
  0x4c   :  { %v247_v14 = vmul.f32 %v1419_v12, %v1419_v12  ;;  %v335_v10 = vsel %vm82_vm1, %v246_v49, 0.0  ;;  %v1427_v49 = vld [vmem:[#allocation15_spill] sm:$0xff]  ;;  %v1428_v12 = vld [vmem:[#allocation16_spill] sm:$0xff] }
  0x4d   :  { %v159_v25 = vadd.f32 %v1412_v55, %v157_v63  ;;  %v324_v60 = vadd.f32 %v323_v16, %v322_v24  ;;  %v1420_v16 = vld [vmem:[#allocation11_spill] sm:$0xff]  ;;  %v1421_v24 = vld [vmem:[#allocation48_spill] sm:$0xff] }
  0x4e   :  { %v248_v7 = vmul.f32 %v1421_v24, %v1421_v24  ;;  %v337_v51 = vsel %vm82_vm1, %v247_v14, 0.0 }
  0x4f   :  { %v161_v58 = vadd.f32 %v1414_v15, %v159_v25  ;;  %v326_v0 = vadd.f32 %v325_v1, %v324_v60  ;;  %v1422_v1 = vld [vmem:[#allocation12_spill] sm:$0xff] }
  0x50   :  { %v1423_v60 = vld [vmem:[#allocation52_spill] sm:$0xff]  ;;  %v339_v5 = vsel %vm82_vm1, %v248_v7, 0.0  ;;  %v1430_v7 = vld [vmem:[#allocation18_spill] sm:$0xff] }
  0x51   :  { %v163_v20 = vadd.f32 %v1416_v56, %v161_v58  ;;  %v328_v3 = vadd.f32 %v327_v2, %v326_v0  ;;  %v249_v6 = vmul.f32 %v1423_v60, %v1423_v60  ;;  %v1424_v2 = vld [vmem:[#allocation13_spill] sm:$0xff] }
  0x52   :  { %v1425_v0 = vld [vmem:[#allocation53_spill] sm:$0xff] }
  0x53   :  { %v165_v62 = vadd.f32 %v1418_v30, %v163_v20  ;;  %v330_v9 = vadd.f32 %v329_v17, %v328_v3  ;;  %v250_v61 = vmul.f32 %v1425_v0, %v1425_v0  ;;  %v1426_v17 = vld [vmem:[#allocation14_spill] sm:$0xff]  ;;  %v251_v3 = vmul.f32 %v1165_v32, %v1165_v32 }
  0x54   :  { %v341_v34 = vsel %vm82_vm1, %v249_v6, 0.0  ;;  %v1432_v6 = vld [vmem:[#allocation20_spill] sm:$0xff]  ;;  %v1434_v0 = vld [vmem:[#allocation22_spill] sm:$0xff] }
  0x55   :  { %v167_v41 = vadd.f32 %v1420_v16, %v165_v62  ;;  %v332_v63 = vadd.f32 %v331_v35, %v330_v9  ;;  %v252_v62 = vmul.f32 %v1183_v43, %v1183_v43  ;;  %v343_v9 = vsel %vm82_vm1, %v250_v61, 0.0 }
  0x56   :  { %v345_v16 = vsel %vm82_vm1, %v251_v3, 0.0  ;;  %v1436_v3 = vld [vmem:[#allocation24_spill] sm:$0xff] }
  0x57   :  { %v169_v55 = vadd.f32 %v1422_v1, %v167_v41  ;;  %v334_v25 = vadd.f32 %v333_v11, %v332_v63  ;;  %v1429_v41 = vld [vmem:[#allocation17_spill] sm:$0xff]  ;;  %v347_v32 = vsel %vm82_vm1, %v252_v62, 0.0  ;;  %v1438_v62 = vld [vmem:[#allocation27_spill] sm:$0xff] }
  0x59   :  { %v171_v15 = vadd.f32 %v1424_v2, %v169_v55  ;;  %v336_v58 = vadd.f32 %v335_v10, %v334_v25  ;;  %v1431_v55 = vld [vmem:[#allocation19_spill] sm:$0xff]  ;;  %v1433_v2 = vld [vmem:[#allocation21_spill] sm:$0xff] }
  0x5b   :  { %v173_v56 = vadd.f32 %v1426_v17, %v171_v15  ;;  %v338_v20 = vadd.f32 %v337_v51, %v336_v58  ;;  %v1435_v17 = vld [vmem:[#allocation23_spill] sm:$0xff] }
  0x5d   :  { %v175_v35 = vadd.f32 %v1427_v49, %v173_v56  ;;  %v340_v30 = vadd.f32 %v339_v5, %v338_v20 }
  0x5f   :  { %v177_v14 = vadd.f32 %v1428_v12, %v175_v35  ;;  %v342_v11 = vadd.f32 %v341_v34, %v340_v30  ;;  %v1437_v35 = vld [vmem:[#allocation25_spill] sm:$0xff]  ;;  %v1439_v12 = vld [vmem:[#allocation28_spill] sm:$0xff] }
  0x61   :  { %v179_v63 = vadd.f32 %v1429_v41, %v177_v14  ;;  %v344_v24 = vadd.f32 %v343_v9, %v342_v11  ;;  %v1440_v11 = vld [vmem:[#allocation29_spill] sm:$0xff]  ;;  %v1441_v41 = vld [vmem:[#allocation31_spill] sm:$0xff] }
  0x63   :  { %v181_v10 = vadd.f32 %v1430_v7, %v179_v63  ;;  %v346_v1 = vadd.f32 %v345_v16, %v344_v24  ;;  %v1442_v24 = vld [vmem:[#allocation32_spill] sm:$0xff]  ;;  %v1443_v7 = vld [vmem:[#allocation33_spill] sm:$0xff] }
  0x65   :  { %v183_v25 = vadd.f32 %v1431_v55, %v181_v10  ;;  %v348_v60 = vadd.f32 %v347_v32, %v346_v1  ;;  %v1444_v1 = vld [vmem:[#allocation34_spill] sm:$0xff] }
  0x67   :  { %v185_v43 = vadd.f32 %v1432_v6, %v183_v25  ;;  %v350_v51 = vadd.f32 %v1072_v50, %v348_v60 }
  0x69   :  { %v187_v15 = vadd.f32 %v1433_v2, %v185_v43  ;;  %v352_v58 = vadd.f32 %v1075_v31, %v350_v51 }
  0x6b   :  { %v189_v61 = vadd.f32 %v1434_v0, %v187_v15  ;;  %v354_v5 = vadd.f32 %v1078_v26, %v352_v58 }
  0x6d   :  { %v191_v56 = vadd.f32 %v1435_v17, %v189_v61  ;;  %v356_v20 = vadd.f32 %v1081_v44, %v354_v5 }
  0x6f   :  { %v193_v34 = vadd.f32 %v1436_v3, %v191_v56  ;;  %v358_v49 = vadd.f32 %v1084_v57, %v356_v20 }
  0x71   :  { %v195_v30 = vadd.f32 %v1437_v35, %v193_v34  ;;  %v360_v50 = vadd.f32 %v1088_v13, %v358_v49 }
  0x73   :  { %v197_v9 = vadd.f32 %v1438_v62, %v195_v30  ;;  %v362_v31 = vadd.f32 %v1091_v18, %v360_v50 }
  0x75   :  { %v199_v14 = vadd.f32 %v1439_v12, %v197_v9  ;;  %v364_v26 = vadd.f32 %v1094_v19, %v362_v31 }
  0x77   :  { %v201_v16 = vadd.f32 %v1440_v11, %v199_v14  ;;  %v366_v44 = vadd.f32 %v1097_v21, %v364_v26 }
  0x79   :  { %v203_v63 = vadd.f32 %v1441_v41, %v201_v16  ;;  %v368_v57 = vadd.f32 %v1100_v22, %v366_v44 }
  0x7b   :  { %v205_v32 = vadd.f32 %v1442_v24, %v203_v63  ;;  %v370_v13 = vadd.f32 %v1103_v23, %v368_v57 }
  0x7d   :  { %v207_v10 = vadd.f32 %v1443_v7, %v205_v32  ;;  %v372_v18 = vadd.f32 %v1107_v45, %v370_v13  ;;  %v81_v45 = vld [vmem:[%s1319_s1] sm:$0x1] }
  0x7f   :  { %v209_v55 = vadd.f32 %v1444_v1, %v207_v10  ;;  %v374_v19 = vadd.f32 %v1110_v4, %v372_v18 }
  0x81   :  { %v210_v25 = vrot.slane %v209_v55, 4  ;;  %v376_v60 = vadd.f32 %v1113_v27, %v374_v19 }
  0x83   :  { %v211_v21 = vadd.f32 %v210_v25, %v209_v55  ;;  %v378_v6 = vadd.f32 %v1116_v28, %v376_v60 }
  0x85   :  { %v212_v43 = vrot.slane %v211_v21, 2  ;;  %v380_v22 = vadd.f32 %v1119_v29, %v378_v6 }
  0x87   :  { %v213_v51 = vadd.f32 %v212_v43, %v211_v21  ;;  %v382_v23 = vadd.f32 %v1122_v33, %v380_v22 }
  0x89   :  { %v214_v2 = vrot.slane %v213_v51, 1  ;;  %v384_v15 = vadd.f32 %v1126_v40, %v382_v23 }
  0x8b   :  { %v215_v4 = vadd.f32 %v214_v2, %v213_v51  ;;  %v386_v58 = vadd.f32 %v1129_v42, %v384_v15 }
  0x8d   :  { %v216_v27 = vadd.f32 %v215_v4, %v81_v45  ;;  %v388_v0 = vadd.f32 %v1132_v46, %v386_v58 }
  0x8f   :  { %218 = vst.msk [vmem:[%s1319_s1] sm:$0x1] %vm14_vm0, %v216_v27  ;;  %v390_v28 = vadd.f32 %v1135_v47, %v388_v0 }
  0x91   :  { %v392_v29 = vadd.f32 %v1138_v39, %v390_v28 }
  0x93   :  { %v394_v33 = vadd.f32 %v1141_v48, %v392_v29 }
  0x95   :  { %v396_v40 = vadd.f32 %v1145_v37, %v394_v33  ;;  %v219_v37 = vld [vmem:[%s1320_s2] sm:$0x1] }
  0x97   :  { %v398_v61 = vadd.f32 %v1148_v53, %v396_v40 }
  0x99   :  { %v400_v42 = vadd.f32 %v1151_v54, %v398_v61 }
  0x9b   :  { %v402_v5 = vadd.f32 %v1154_v38, %v400_v42 }
  0x9d   :  { %v404_v46 = vadd.f32 %v1157_v59, %v402_v5 }
  0x9f   :  { %v406_v17 = vadd.f32 %v1160_v36, %v404_v46 }
  0xa1   :  { %v408_v56 = vadd.f32 %v1169_v52, %v406_v17 }
  0xa3   :  { %v410_v47 = vadd.f32 %v1172_v8, %v408_v56 }
  0xa5   :  { %v411_v20 = vrot.slane %v410_v47, 4 }
  0xa7   :  { %v412_v39 = vadd.f32 %v411_v20, %v410_v47 }
  0xa9   :  { %v413_v3 = vrot.slane %v412_v39, 2 }
  0xab   :  { %v414_v48 = vadd.f32 %v413_v3, %v412_v39 }
  0xad   :  { %v415_v34 = vrot.slane %v414_v48, 1 }
  0xaf   :  { %v416_v53 = vadd.f32 %v415_v34, %v414_v48 }
  0xb1   :  { %v417_v54 = vadd.f32 %v416_v53, %v219_v37 }
  0xb3   :  { %418 = vst.msk [vmem:[%s1320_s2] sm:$0x1] %vm14_vm0, %v417_v54 }

// kernel: transition_rense_forward.3
= control target key start
LH: loop header
LB: loop body
LE: loop exit
PB: predicated region body
PF: predicated region fallthrough
CT: control target
= control target key end

     0   :  { %8 = vsyncpa [#allocation3], 0  ;;  %s618_s0 = inlined_call_operand.hbm [shape: f32[16,2,8,8], index: 0, kind: input, shape index: {}]   ;;  %s619_s1 = inlined_call_operand.hbm [shape: f32[8,8], index: 1, kind: input, shape index: {}]   ;;  %s620_s2 = inlined_call_operand.hbm [shape: f32[1,8], index: 2, kind: input, shape index: {}]   ;;  %s621_s3 = inlined_call_operand.hbm [shape: f32[128,8], index: 3, kind: output, shape index: {}]  }
   0x1   :  { %9 = vsyncpa [#allocation6], 0 }
   0x2   :  { %10 = vsyncpa [#allocation4], 0  ;;  %s499_s12 = smov [#allocation5]   ;;  %s500_s14 = smov [#allocation2]  }
   0x3   :  { %s29_s13 = sshll.u32 %s499_s12, 4  ;;  %s16_s15 = sshll.u32 %s500_s14, 4  ;;  %s30_s13 = int_to_ptr.vmem [resolvable:$true] %s29_s13  ;;  %s525_s15 = int_to_ptr.vmem [resolvable:$true] %s16_s15 }
   0x4   :  { %s405_s18 = scalar_lea.hbm %s619_s1, 128 }
   0x5   :  { %p406_p0 = scmp.ne.s32.totalorder %s619_s1, %s405_s18  ;;  %p409_p1 = scmp.lt.u32.totalorder %s405_s18, %s619_s1 }
   0x7   :  { %p411_p2 = pnand %p409_p1, %p406_p0 }
   0x9   :  { %414 = shalt.err (!%p411_p2)
}
   0xa   :  { %s415_s23 = scalar_lea.vmem %s30_s13, 128  ;;  %p420_p4 = scmp.lt.s32.totalorder %s30_s13, %s30_s13 }
   0xb   :  { %p416_p3 = scmp.ne.s32.totalorder %s30_s13, %s415_s23  ;;  %p421_p5 = scmp.lt.s32.totalorder %s415_s23, %s415_s23 }
   0xd   :  { %p422_p6 = por %p421_p5, %p420_p4 }
   0xf   :  { %p423_p7 = pnand %p422_p6, %p416_p3 }
  0x11   :  { %426 = shalt.err (!%p423_p7)
}
  0x12   :  { %32 = dma.hbm_to_vmem [thread:$0]  %s619_s1, 128, %s30_s13, [#allocation6]  }
  0x13   :  { %s427_s28 = scalar_lea.hbm %s618_s0, 4096 }
  0x14   :  { %p428_p8 = scmp.ne.s32.totalorder %s618_s0, %s427_s28  ;;  %p431_p9 = scmp.lt.u32.totalorder %s427_s28, %s618_s0 }
  0x16   :  { %p433_p10 = pnand %p431_p9, %p428_p8 }
  0x18   :  { %436 = shalt.err (!%p433_p10)
}
  0x19   :  { %s437_s6 = scalar_lea.vmem %s525_s15, 4096  ;;  %p442_p12 = scmp.lt.s32.totalorder %s525_s15, %s525_s15 }
  0x1a   :  { %p438_p11 = scmp.ne.s32.totalorder %s525_s15, %s437_s6  ;;  %p443_p13 = scmp.lt.s32.totalorder %s437_s6, %s437_s6 }
  0x1c   :  { %p444_p0 = por %p443_p13, %p442_p12 }
  0x1e   :  { %p445_p1 = pnand %p444_p0, %p438_p11 }
  0x20   :  { %448 = shalt.err (!%p445_p1)
}
  0x21   :  { %s501_s1 = smov 128   ;;  %s502_s7 = smov 8  }
  0x22   :  { %22 = dma.hbm_to_vmem [thread:$0]  %s618_s0, 4096, %s525_s15, [#allocation3], %s501_s1, %s501_s1, %s502_s7  }
  0x23   :  { %s503_s10 = smov [#allocation7]   ;;  %s449_s14 = scalar_lea.hbm %s620_s2, 16 }
  0x24   :  { %s39_s11 = sshll.u32 %s503_s10, 4  ;;  %p450_p2 = scmp.ne.s32.totalorder %s620_s2, %s449_s14  ;;  %s40_s11 = int_to_ptr.vmem [resolvable:$true] %s39_s11 }
  0x25   :  { %p453_p3 = scmp.lt.u32.totalorder %s449_s14, %s620_s2 }
  0x27   :  { %p455_p4 = pnand %p453_p3, %p450_p2 }
  0x29   :  { %458 = shalt.err (!%p455_p4)
}
  0x2a   :  { %s459_s20 = scalar_lea.vmem %s40_s11, 16  ;;  %s463_s0 = scalar_lea.vmem %s40_s11, 32 }
  0x2b   :  { %p460_p5 = scmp.ne.s32.totalorder %s40_s11, %s459_s20  ;;  %p464_p6 = scmp.lt.s32.totalorder %s40_s11, %s40_s11 }
  0x2c   :  { %p465_p7 = scmp.lt.s32.totalorder %s463_s0, %s459_s20 }
  0x2e   :  { %p466_p8 = por %p465_p7, %p464_p6 }
  0x30   :  { %p467_p9 = pnand %p466_p8, %p460_p5 }
  0x32   :  { %470 = shalt.err (!%p467_p9)
}
  0x33   :  { %42 = dma.hbm_to_vmem [thread:$0]  %s620_s2, 16, %s40_s11, [#allocation6]  }
  0x34   :  { %493 = dma.done.wait [#allocation3], 4096  }
  0x35   :  { %494 = vsyncadd [#allocation3], 4294963200 }
  0x36   :  { %495 = dma.done.wait [#allocation6], 144  }
  0x37   :  { %496 = vsyncadd [#allocation6], 4294967152  ;;  %v101_v0 = vld [vmem:[#allocation5] sm:$0xff]  ;;  %v69_v2 = vld [vmem:[#allocation2 + $0x8] sm:$0xff]  ;;  %vm109_vm0 = vcmask 64512   ;;  %s504_s2 = smov [#allocation8]  }
  0x38   :  { %v52_v1 = vld [vmem:[#allocation2] sm:$0xff]  ;;  %371 = vmatprep.subr.mxu0 %v101_v0  ;;  %397 = vmatprep.subr.mxu1 %v101_v0  ;;  %v77_v5 = vld [vmem:[#allocation2 + $0x88] sm:$0xff]  ;;  %v53_v6 = vld [vmem:[#allocation2 + $0x10] sm:$0xff]  ;;  %s324_s22 = sshll.u32 %s504_s2, 4  ;;  %s325_s22 = int_to_ptr.vmem [resolvable:$true] %s324_s22 }
  0x39   :  { %v85_v3 = vadd.f32 %v69_v2, %v52_v1  ;;  %v60_v4 = vld [vmem:[#allocation2 + $0x80] sm:$0xff]  ;;  %372 = vmatpush3.msra.mxu0 %v101_v0  ;;  %398 = vmatpush3.msra.mxu1 %v101_v0  ;;  %v70_v8 = vld [vmem:[#allocation2 + $0x18] sm:$0xff]  ;;  %v61_v9 = vld [vmem:[#allocation2 + $0x90] sm:$0xff]  ;;  %s471_s23 = scalar_lea.vmem %s325_s22, 2048  ;;  %p476_p11 = scmp.lt.s32.totalorder %s325_s22, %s325_s22 }
  0x3a   :  { %v93_v7 = vadd.f32 %v77_v5, %v60_v4  ;;  %v78_v10 = vld [vmem:[#allocation2 + $0x98] sm:$0xff]  ;;  %v86_v11 = vadd.f32 %v70_v8, %v53_v6  ;;  %v54_v13 = vld [vmem:[#allocation2 + $0x20] sm:$0xff]  ;;  %v71_v14 = vld [vmem:[#allocation2 + $0x28] sm:$0xff]  ;;  %p472_p10 = scmp.ne.s32.totalorder %s325_s22, %s471_s23  ;;  %p477_p12 = scmp.lt.s32.totalorder %s471_s23, %s471_s23 }
  0x3b   :  { %373 = vmatprep.mubr.msk.f32.mxu0 %vm109_vm0, %v85_v3  ;;  %v94_v12 = vadd.f32 %v78_v10, %v61_v9  ;;  %v62_v15 = vld [vmem:[#allocation2 + $0xa0] sm:$0xff]  ;;  %v87_v16 = vadd.f32 %v71_v14, %v54_v13  ;;  %v79_v17 = vld [vmem:[#allocation2 + $0xa8] sm:$0xff]  ;;  %v55_v18 = vld [vmem:[#allocation2 + $0x30] sm:$0xff] }
  0x3c   :  { %385 = vmatprep.mubr.msk.f32.mxu1 %vm109_vm0, %v93_v7  ;;  %v72_v19 = vld [vmem:[#allocation2 + $0x38] sm:$0xff]  ;;  %374 = vmatmul.mubr.msk.f32.vlgmr.msra.gmra.mrb[0].mxu0 %vm109_vm0, %v86_v11  ;;  %v95_v20 = vadd.f32 %v79_v17, %v62_v15  ;;  %v63_v22 = vld [vmem:[#allocation2 + $0xb0] sm:$0xff]  ;;  %v56_v24 = vld [vmem:[#allocation2 + $0x40] sm:$0xff]  ;;  %p478_p13 = por %p477_p12, %p476_p11 }
  0x3d   :  { %386 = vmatmul.mubr.msk.f32.vlgmr.msra.gmra.mrb[0].mxu1 %vm109_vm0, %v94_v12  ;;  %v88_v21 = vadd.f32 %v72_v19, %v55_v18  ;;  %v80_v23 = vld [vmem:[#allocation2 + $0xb8] sm:$0xff]  ;;  %376 = vmatprep.mubr.msk.f32.mxu0 %vm109_vm0, %v87_v16  ;;  %v73_v26 = vld [vmem:[#allocation2 + $0x48] sm:$0xff]  ;;  %v64_v27 = vld [vmem:[#allocation2 + $0xc0] sm:$0xff] }
  0x3e   :  { %v96_v25 = vadd.f32 %v80_v23, %v63_v22  ;;  %v81_v28 = vld [vmem:[#allocation2 + $0xc8] sm:$0xff]  ;;  %388 = vmatprep.mubr.msk.f32.mxu1 %vm109_vm0, %v95_v20  ;;  %v89_v29 = vadd.f32 %v73_v26, %v56_v24  ;;  %v57_v31 = vld [vmem:[#allocation2 + $0x50] sm:$0xff]  ;;  %v74_v32 = vld [vmem:[#allocation2 + $0x58] sm:$0xff]  ;;  %p479_p0 = pnand %p478_p13, %p472_p10 }
  0x3f   :  { %v97_v30 = vadd.f32 %v81_v28, %v64_v27  ;;  %v65_v33 = vld [vmem:[#allocation2 + $0xd0] sm:$0xff]  ;;  %v82_v34 = vld [vmem:[#allocation2 + $0xd8] sm:$0xff]  ;;  %v58_v35 = vld [vmem:[#allocation2 + $0x60] sm:$0xff]  ;;  %v90_v37 = vadd.f32 %v74_v32, %v57_v31 }
  0x40   :  { %v75_v36 = vld [vmem:[#allocation2 + $0x68] sm:$0xff]  ;;  %377 = vmatmul.mubr.msk.f32.gmra.mrb[2].mxu0 %vm109_vm0, %v88_v21  ;;  %v98_v38 = vadd.f32 %v82_v34, %v65_v33  ;;  %v66_v39 = vld [vmem:[#allocation2 + $0xe0] sm:$0xff]  ;;  %v59_v41 = vld [vmem:[#allocation2 + $0x70] sm:$0xff] }
  0x41   :  { %389 = vmatmul.mubr.msk.f32.gmra.mrb[2].mxu1 %vm109_vm0, %v96_v25  ;;  %v83_v40 = vld [vmem:[#allocation2 + $0xe8] sm:$0xff]  ;;  %379 = vmatprep.mubr.msk.f32.mxu0 %vm109_vm0, %v89_v29  ;;  %v91_v42 = vadd.f32 %v75_v36, %v58_v35  ;;  %v76_v44 = vld [vmem:[#allocation2 + $0x78] sm:$0xff]  ;;  %v67_v45 = vld [vmem:[#allocation2 + $0xf0] sm:$0xff] }
  0x42   :  { %391 = vmatprep.mubr.msk.f32.mxu1 %vm109_vm0, %v97_v30  ;;  %v99_v43 = vadd.f32 %v83_v40, %v66_v39  ;;  %v84_v46 = vld [vmem:[#allocation2 + $0xf8] sm:$0xff]  ;;  %v92_v47 = vadd.f32 %v76_v44, %v59_v41  ;;  %v337_v49 = vld [vmem:[#allocation7] ss:$0 sm:$0xff] }
  0x43   :  { %v100_v48 = vadd.f32 %v84_v46, %v67_v45 }
  0x44   :  { %380 = vmatmul.mubr.msk.f32.gmra.mrb[4].mxu0 %vm109_vm0, %v90_v37 }
  0x45   :  { %392 = vmatmul.mubr.msk.f32.gmra.mrb[4].mxu1 %vm109_vm0, %v98_v38  ;;  %382 = vmatprep.mubr.msk.f32.mxu0 %vm109_vm0, %v91_v42 }
  0x46   :  { %394 = vmatprep.mubr.msk.f32.mxu1 %vm109_vm0, %v99_v43 }
  0x48   :  { %383 = vmatmul.mubr.msk.f32.gmra.mrb[6].mxu0 %vm109_vm0, %v92_v47 }
  0x49   :  { %395 = vmatmul.mubr.msk.f32.gmra.mrb[6].mxu1 %vm109_vm0, %v100_v48 }
 0x10f   :  { %v375_v50 = vpop.f32.mrb[0].mxu0 }
 0x110   :  { %v387_v51 = vpop.f32.mrb[0].mxu1  ;;  %v230_v52 = vadd.f32 %v375_v50, %v337_v49  ;;  %v224_v54 = vpop.f32.mrb[1].mxu0 }
 0x111   :  { %v270_v53 = vadd.f32 %v387_v51, %v337_v49  ;;  %v264_v55 = vpop.f32.mrb[1].mxu1  ;;  %v225_v56 = vadd.f32 %v337_v49, %v224_v54 }
 0x112   :  { %v265_v57 = vadd.f32 %v337_v49, %v264_v55  ;;  %304 = vst.msk [vmem:[#allocation8 + $0x8] sm:$0xff] %vm109_vm0, %v230_v52 }
 0x113   :  { %312 = vst.msk [vmem:[#allocation8 + $0x48] sm:$0xff] %vm109_vm0, %v270_v53  ;;  %303 = vst.msk [vmem:[#allocation8] sm:$0xff] %vm109_vm0, %v225_v56  ;;  %v378_v58 = vpop.f32.mrb[2].mxu0 }
 0x114   :  { %311 = vst.msk [vmem:[#allocation8 + $0x40] sm:$0xff] %vm109_vm0, %v265_v57  ;;  %v390_v59 = vpop.f32.mrb[2].mxu1  ;;  %v240_v60 = vadd.f32 %v378_v58, %v337_v49  ;;  %v234_v62 = vpop.f32.mrb[3].mxu0 }
 0x115   :  { %v280_v61 = vadd.f32 %v390_v59, %v337_v49  ;;  %v274_v63 = vpop.f32.mrb[3].mxu1  ;;  %v235_v0 = vadd.f32 %v337_v49, %v234_v62 }
 0x116   :  { %v275_v1 = vadd.f32 %v337_v49, %v274_v63  ;;  %306 = vst.msk [vmem:[#allocation8 + $0x18] sm:$0xff] %vm109_vm0, %v240_v60 }
 0x117   :  { %314 = vst.msk [vmem:[#allocation8 + $0x58] sm:$0xff] %vm109_vm0, %v280_v61  ;;  %305 = vst.msk [vmem:[#allocation8 + $0x10] sm:$0xff] %vm109_vm0, %v235_v0  ;;  %v381_v2 = vpop.f32.mrb[4].mxu0 }
 0x118   :  { %313 = vst.msk [vmem:[#allocation8 + $0x50] sm:$0xff] %vm109_vm0, %v275_v1  ;;  %v393_v3 = vpop.f32.mrb[4].mxu1  ;;  %v250_v4 = vadd.f32 %v381_v2, %v337_v49  ;;  %v244_v6 = vpop.f32.mrb[5].mxu0 }
 0x119   :  { %v290_v5 = vadd.f32 %v393_v3, %v337_v49  ;;  %v284_v7 = vpop.f32.mrb[5].mxu1  ;;  %v245_v8 = vadd.f32 %v337_v49, %v244_v6 }
 0x11a   :  { %v285_v9 = vadd.f32 %v337_v49, %v284_v7  ;;  %308 = vst.msk [vmem:[#allocation8 + $0x28] sm:$0xff] %vm109_vm0, %v250_v4 }
 0x11b   :  { %316 = vst.msk [vmem:[#allocation8 + $0x68] sm:$0xff] %vm109_vm0, %v290_v5  ;;  %307 = vst.msk [vmem:[#allocation8 + $0x20] sm:$0xff] %vm109_vm0, %v245_v8  ;;  %v384_v10 = vpop.f32.mrb[6].mxu0 }
 0x11c   :  { %315 = vst.msk [vmem:[#allocation8 + $0x60] sm:$0xff] %vm109_vm0, %v285_v9  ;;  %v396_v11 = vpop.f32.mrb[6].mxu1  ;;  %v260_v12 = vadd.f32 %v384_v10, %v337_v49  ;;  %v254_v14 = vpop.f32.mrb[7].mxu0 }
 0x11d   :  { %v300_v13 = vadd.f32 %v396_v11, %v337_v49  ;;  %v294_v15 = vpop.f32.mrb[7].mxu1  ;;  %v255_v16 = vadd.f32 %v337_v49, %v254_v14 }
 0x11e   :  { %v295_v17 = vadd.f32 %v337_v49, %v294_v15  ;;  %310 = vst.msk [vmem:[#allocation8 + $0x38] sm:$0xff] %vm109_vm0, %v260_v12 }
 0x11f   :  { %318 = vst.msk [vmem:[#allocation8 + $0x78] sm:$0xff] %vm109_vm0, %v300_v13  ;;  %309 = vst.msk [vmem:[#allocation8 + $0x30] sm:$0xff] %vm109_vm0, %v255_v16 }
 0x120   :  { %317 = vst.msk [vmem:[#allocation8 + $0x70] sm:$0xff] %vm109_vm0, %v295_v17 }
 0x121   :  { %482 = shalt.err (!%p479_p0)
}
 0x122   :  { %s483_s26 = scalar_lea.hbm %s621_s3, 2048 }
 0x123   :  { %p484_p1 = scmp.ne.s32.totalorder %s621_s3, %s483_s26  ;;  %p487_p2 = scmp.lt.u32.totalorder %s483_s26, %s621_s3 }
 0x125   :  { %p489_p3 = pnand %p487_p2, %p484_p1 }
 0x127   :  { %492 = shalt.err (!%p489_p3)
}
 0x128   :  { %330 = dma.vmem_to_hbm [thread:$0]  %s325_s22, 2048, %s621_s3, [#allocation4], %s501_s1, %s501_s1, %s502_s7  }
 0x129   :  { %497 = dma.done.wait [#allocation4], 2048  }
 0x12a   :  { %498 = vsyncadd [#allocation4], 4294965248 }
 0x12b   :  { %334 = vsyncpa [#allocation3], 1 }
 0x12c   :  { %335 = vsyncpa [#allocation6], 1 }
 0x12d   :  { %336 = vsyncpa [#allocation4], 1 }

</bundles_post_ra>
